<compile_context>
chip_gen: v6e
topology: v6e:2x2x1
jax: 0.10.0
libtpu: 0.0.40
codegen_flags: <defaults>
</compile_context>

<pallas_src>
import math

import jax
import jax.numpy as jnp
from jax.experimental import pallas as pl
from jax.experimental.pallas import tpu as pltpu


_LANE = 128
_MAX_PATTERN_BYTES = 2 * 1024 * 1024   # cap on the repeated-row pattern held in VMEM


def _sublane(dtype) -> int:
    # f32 -> 8, bf16 -> 16, int8/fp8 -> 32 (packed dtypes pack along sublanes).
    return max(8, 32 // jnp.dtype(dtype).itemsize)


def _chip_budgets():
    """(target output-block bytes, vmem limit bytes, output buffer count)."""
    try:
        vmem_cap = pltpu.get_tpu_info().vmem_capacity_bytes
    except Exception:
        vmem_cap = 64 * 1024 * 1024              # conservative: assume v7x-sized VMEM
    if vmem_cap >= 100 * 1024 * 1024:            # v5e / v6e: 128 MiB physical VMEM
        return 24 * 1024 * 1024, 96 * 1024 * 1024, 3
    # v7x: 64 MiB physical VMEM -> 3 x 12 MiB output buffers + tiny input << 48 MiB
    return 12 * 1024 * 1024, 48 * 1024 * 1024, 3


def _round_down(x: int, m: int) -> int:
    return (x // m) * m


def _round_up(x: int, m: int) -> int:
    return ((x + m - 1) // m) * m


def _sos_fill_kernel(pat_ref, out_ref):
    """Fill the (tb, tl) output tile by repeating the (p, tl) pattern rows."""
    p = pat_ref.shape[0]
    tb = out_ref.shape[0]
    if p == 1:
        out_ref[...] = jnp.broadcast_to(pat_ref[...], out_ref.shape)
    elif p == tb:
        out_ref[...] = pat_ref[...]
    else:
        # p is a multiple of the sublane count here, so merging the leading
        # dims after the broadcast is a layout-preserving (free) reshape.
        reps = tb // p
        pat = pat_ref[...]
        out_ref[...] = jnp.broadcast_to(
            pat[None], (reps, p, pat.shape[1])).reshape(out_ref.shape)


def sos_embedding_forward(sos_embedding: jax.Array, batch_size: int) -> jax.Array:
    """Return (batch_size, embedding_dim): learned SOS embedding broadcast over batch."""
    if sos_embedding.ndim != 1:
        non_unit = [d for d in sos_embedding.shape if d != 1]
        assert len(non_unit) <= 1, (
            f"sos_embedding must be a single vector, got {sos_embedding.shape}")
        sos_embedding = sos_embedding.reshape(-1)

    D = int(sos_embedding.shape[0])
    dtype = sos_embedding.dtype
    itemsize = jnp.dtype(dtype).itemsize
    sub = _sublane(dtype)
    block_bytes, vmem_limit, out_buffers = _chip_budgets()

    # ---- choose output layout (lane density is the dominant lever) ----------
    fold = False
    period = 1
    if D % _LANE == 0:
        pass                                    # already lane dense: write (B, D)
    elif (batch_size * D) % _LANE == 0:
        period_try = math.lcm(D, _LANE) // _LANE
        granule_try = math.lcm(period_try, sub)
        if granule_try * _LANE * itemsize <= _MAX_PATTERN_BYTES:
            fold, period = True, period_try
    # else:
    # TODO(synk): ragged flat extent (B*D not 128-aligned) keeps masked
    # lane-partial stores; a 128-aligned-prefix fold plus wrapper-side
    # remainder would recover lane density at the cost of an extra copy.

    if fold:
        out_rows = (batch_size * D) // _LANE
        lane_width = _LANE
    else:
        out_rows = batch_size
        lane_width = D

    granule = math.lcm(period, sub)             # row-tile granularity

    # ---- lane tile (guards very wide embeddings against VMEM blow-up) -------
    if lane_width <= _LANE:
        tl = lane_width                         # full extent (narrow: masked but correct)
    else:
        max_lanes = max(_LANE, _round_down(block_bytes // (granule * itemsize), _LANE))
        base = lane_width if lane_width % _LANE == 0 else _round_down(lane_width, _LANE)
        tl = max(_LANE, min(base, max_lanes))

    # ---- row tile ------------------------------------------------------------
    if out_rows <= granule:
        tb = out_rows                           # full-extent block is always legal
        pat_rows = out_rows if period > 1 else 1
    else:
        max_rows = max(granule, _round_down(block_bytes // (tl * itemsize), granule))
        tb = min(_round_down(out_rows, granule), max_rows)
        if out_rows >= 4 * granule:
            # Keep >= ~4 row tiles so the "parallel" axis feeds both v7x cores
            # (and per-step overhead stays amortized); neutral on v5e/v6e.
            tb = min(tb, _round_up(pl.cdiv(out_rows, 4), granule))
        tb = max(tb, granule)
        pat_rows = granule if period > 1 else 1

    # ---- build the small pattern the kernel repeats --------------------------
    if fold:
        pattern = jnp.tile(sos_embedding, (pat_rows * _LANE) // D).reshape(pat_rows, _LANE)
    else:
        pattern = sos_embedding.reshape(1, D)

    grid = (pl.cdiv(out_rows, tb), pl.cdiv(lane_width, tl))

    def _run(buffered: bool):
        if buffered:
            out_spec = pl.BlockSpec((tb, tl), lambda i, j: (i, j),
                                    pipeline_mode=pl.Buffered(out_buffers))
        else:
            out_spec = pl.BlockSpec((tb, tl), lambda i, j: (i, j))
        return pl.pallas_call(
            _sos_fill_kernel,
            out_shape=jax.ShapeDtypeStruct((out_rows, lane_width), dtype),
            grid=grid,
            in_specs=[pl.BlockSpec((pat_rows, tl), lambda i, j: (0, j))],
            out_specs=out_spec,
            compiler_params=pltpu.CompilerParams(
                dimension_semantics=("parallel", "parallel"),
                vmem_limit_bytes=vmem_limit,
            ),
        )(pattern)

    try:
        out2d = _run(True)    # 3-deep output buffering keeps store DMAs back-to-back
    except Exception:
        out2d = _run(False)   # fall back to default 2-deep pipelining

    if fold:
        return out2d.reshape(batch_size, D)
    return out2d


if __name__ == "__main__":
    key = jax.random.PRNGKey(0)

    # Primary demo shape consistent with the module contract (small).
    batch_size, embedding_dim = 2, 32
    sos = jax.random.normal(key, (embedding_dim,), dtype=jnp.float32)
    out = jax.block_until_ready(sos_embedding_forward(sos, batch_size))
    ref = jnp.broadcast_to(sos[None, :], (batch_size, embedding_dim))
    assert out.shape == (batch_size, embedding_dim) and out.dtype == jnp.float32
    assert jnp.allclose(out, ref)

    # Lane-dense folded path, period == 1 (D=32 divides 128, B*D % 128 == 0).
    out = jax.block_until_ready(sos_embedding_forward(sos, 64))
    assert jnp.allclose(out, jnp.broadcast_to(sos[None, :], (64, 32)))

    # Lane-dense folded path, period > 1, single-tile copy branch (D=96, B=8).
    sos96 = jax.random.normal(jax.random.PRNGKey(0), (96,), dtype=jnp.float32)
    out = jax.block_until_ready(sos_embedding_forward(sos96, 8))
    assert jnp.allclose(out, jnp.broadcast_to(sos96[None, :], (8, 96)))

    # Lane-dense folded path, period > 1, in-kernel repeat branch (D=96, B=64).
    out = jax.block_until_ready(sos_embedding_forward(sos96, 64))
    assert jnp.allclose(out, jnp.broadcast_to(sos96[None, :], (64, 96)))

    # Wide lane-dense direct path with a partial row tile (D multiple of 128).
    sos256 = jax.random.normal(jax.random.PRNGKey(0), (256,), dtype=jnp.float32)
    out = jax.block_until_ready(sos_embedding_forward(sos256, 20))
    assert jnp.allclose(out, jnp.broadcast_to(sos256[None, :], (20, 256)))

    # bf16 path exercises dtype-aware (16-row) sublane granularity.
    sosbf = jax.random.normal(jax.random.PRNGKey(0), (512,),
                              dtype=jnp.float32).astype(jnp.bfloat16)
    out = jax.block_until_ready(sos_embedding_forward(sosbf, 40))
    assert out.dtype == jnp.bfloat16
    assert jnp.array_equal(out, jnp.broadcast_to(sosbf[None, :], (40, 512)))

    print("KERNEL_OK")
</pallas_src>

<mosaic_0001>
module attributes {stable_mosaic.version = 11 : i64} {
  func.func @_sos_fill_kernel(%arg0: i32, %arg1: i32, %arg2: memref<1x32xf32, #tpu.memory_space<vmem>>, %arg3: memref<2x32xf32, #tpu.memory_space<vmem>>) attributes {dimension_semantics = [#tpu.dimension_semantics<parallel>, #tpu.dimension_semantics<parallel>], iteration_bounds = array<i64: 1, 1>, scalar_prefetch = 0 : i64, scratch_operands = 0 : i64, tpu.core_type = #tpu.core_type<tc>, window_params = [{transform_indices = @transform_0, window_bounds = array<i64: 1, 32>}, {transform_indices = @transform_1, window_bounds = array<i64: 2, 32>}]} {
    %c0 = arith.constant 0 : index
    %c0_0 = arith.constant 0 : index
    %0 = vector.load %arg2[%c0, %c0_0] : memref<1x32xf32, #tpu.memory_space<vmem>>, vector<1x32xf32>
    %1 = vector.shape_cast %0 : vector<1x32xf32> to vector<1x32xf32>
    %2 = vector.broadcast %1 : vector<1x32xf32> to vector<2x32xf32>
    %c0_1 = arith.constant 0 : index
    %c0_2 = arith.constant 0 : index
    %3 = vector.load %arg3[%c0_1, %c0_2] : memref<2x32xf32, #tpu.memory_space<vmem>>, vector<2x32xf32>
    tpu.vector_store %arg3[%c0_1, %c0_2], %2 {strides = array<i32>} : memref<2x32xf32, #tpu.memory_space<vmem>>, vector<2x32xf32>,
    return
  }
  func.func @transform_0(%arg0: i32, %arg1: i32) -> (i32, i32) {
    %c0_i32 = arith.constant 0 : i32
    %c0_i32_0 = arith.constant 0 : i32
    return %c0_i32, %arg1 : i32, i32
  }
  func.func @transform_1(%arg0: i32, %arg1: i32) -> (i32, i32) {
    %c0_i32 = arith.constant 0 : i32
    return %arg0, %arg1 : i32, i32
  }
}

</mosaic_0001>

<bundles_post_ra>
// kernel: tpu_custom_call.1
= control target key start
LH: loop header
LB: loop body
LE: loop exit
PB: predicated region body
PF: predicated region fallthrough
CT: control target
= control target key end

     0   :  { %6 = vsyncpa [#allocation3], 0  ;;  %s110_s0 = inlined_call_operand.hbm [shape: f32[1,32], index: 0, kind: input, shape index: {}]   ;;  %s111_s1 = inlined_call_operand.hbm [shape: f32[2,32], index: 1, kind: output, shape index: {}]  }
   0x1   :  { %7 = vsyncpa [#allocation4], 0  ;;  %s92_s6 = smov [#allocation2]  }
   0x2   :  { %s14_s7 = sshll.u32 %s92_s6, 4  ;;  %s15_s7 = int_to_ptr.vmem [resolvable:$true] %s14_s7 }
   0x3   :  { %s56_s8 = scalar_lea.vmem %s15_s7, 16  ;;  %s60_s9 = scalar_lea.vmem %s15_s7, 32 }
   0x4   :  { %p57_p0 = scmp.ne.s32.totalorder %s15_s7, %s56_s8  ;;  %p61_p1 = scmp.lt.s32.totalorder %s15_s7, %s15_s7 }
   0x5   :  { %p62_p2 = scmp.lt.s32.totalorder %s60_s9, %s56_s8 }
   0x7   :  { %p63_p3 = por %p62_p2, %p61_p1 }
   0x9   :  { %p64_p4 = pnand %p63_p3, %p57_p0 }
   0xb   :  { %67 = shalt.err (!%p64_p4)
}
   0xc   :  { %17 = dma.hbm_to_vmem [thread:$0]  %s110_s0, 16, %s15_s7, [#allocation3]  }
   0xd   :  { %88 = dma.done.wait [#allocation3], 16  }
   0xe   :  { %89 = vsyncadd [#allocation3], 4294967280  ;;  %s93_s12 = smov [#allocation5]   ;;  %vm28_vm0 = vcmask 254976   ;;  %v45_v0 = vld [vmem:[#allocation2] ss:$0 sm:$0xff] }
   0xf   :  { %s36_s13 = sshll.u32 %s93_s12, 4  ;;  %29 = vst.msk [vmem:[#allocation5] sm:$0x3] %vm28_vm0, %v45_v0  ;;  %s37_s13 = int_to_ptr.vmem [resolvable:$true] %s36_s13 }
  0x10   :  { %s68_s14 = scalar_lea.vmem %s37_s13, 32  ;;  %p73_p6 = scmp.lt.s32.totalorder %s37_s13, %s37_s13 }
  0x11   :  { %p69_p5 = scmp.ne.s32.totalorder %s37_s13, %s68_s14  ;;  %p74_p7 = scmp.lt.s32.totalorder %s68_s14, %s68_s14 }
  0x13   :  { %p75_p8 = por %p74_p7, %p73_p6 }
  0x15   :  { %p76_p9 = pnand %p75_p8, %p69_p5 }
  0x17   :  { %79 = shalt.err (!%p76_p9)
}
  0x18   :  { %39 = dma.vmem_to_hbm [thread:$0]  %s37_s13, 32, %s111_s1, [#allocation4]  }
  0x19   :  { %90 = dma.done.wait [#allocation4], 32  }
  0x1a   :  { %91 = vsyncadd [#allocation4], 4294967264 }
  0x1b   :  { %43 = vsyncpa [#allocation3], 1 }
  0x1c   :  { %44 = vsyncpa [#allocation4], 1 }

</bundles_post_ra>
